<compile_context>
chip_gen: v6e
topology: v6e:2x2x1
jax: 0.10.0
libtpu: 0.0.40
codegen_flags: <defaults>
</compile_context>

<pallas_src>
import jax
import jax.numpy as jnp
from jax.experimental import pallas as pl
from jax.experimental.pallas import tpu as pltpu


# ----------------------------------------------------------------------------
# Fused kernel: relu(x @ Wt + b) * (2 * scale_inner * scale_outer)
# ----------------------------------------------------------------------------
def _unsupported_module_kernel(x_ref, wt_ref, params_ref, o_ref):
    # x_ref:      (B, F_in)
    # wt_ref:     (F_in, F_out)   -- weight pre-transposed once at init
    # params_ref: (2, F_out)      -- row 0: bias, row 1: 2*scale_inner*scale_outer
    x = x_ref[...]
    y = jnp.dot(x, wt_ref[...], preferred_element_type=jnp.float32)   # MXU, no transpose
    y = jnp.maximum(y + params_ref[0:1, :], 0.0)                      # bias + ReLU (VPU)
    # TODO(synk): `unsupported()` is a torch._dynamo graph-break marker (no runtime
    # graph op); its test-suite body is `a + b`, so unsupported(z, z) == 2*z and the
    # factor of 2 is folded into params row 1 at module init.
    o_ref[...] = (y * params_ref[1:2, :]).astype(o_ref.dtype)


def unsupported_module_forward(x, w_t, params):
    """Fused forward for UnsupportedModule.

    x:      (B, F_in)  f32
    w_t:    (F_in, F_out)  pre-transposed Linear weight
    params: (2, F_out)  row 0 = bias, row 1 = 2 * scale_inner * scale_outer
    """
    B, _ = x.shape
    F_out = w_t.shape[1]

    def vmem_spec():
        return pl.BlockSpec(memory_space=pltpu.MemorySpace.VMEM)

    return pl.pallas_call(
        _unsupported_module_kernel,
        out_shape=jax.ShapeDtypeStruct((B, F_out), x.dtype),
        in_specs=[vmem_spec(), vmem_spec(), vmem_spec()],
        out_specs=vmem_spec(),
    )(x, w_t, params)


# ----------------------------------------------------------------------------
# Module wrapper (mirrors UnsupportedModule / BasicModule parameters)
# ----------------------------------------------------------------------------
class UnsupportedModule:
    def __init__(self, key):
        k_w, k_b, k_s1, k_s2 = jax.random.split(key, 4)
        bound = 1.0 / jnp.sqrt(10.0)  # nn.Linear(10, 10) default init bound
        self.w = jax.random.uniform(k_w, (10, 10), jnp.float32, -bound, bound)
        self.b = jax.random.uniform(k_b, (10,), jnp.float32, -bound, bound)
        self.scale_inner = jax.random.normal(k_s1, (1, 10), jnp.float32)  # BasicModule.scale
        self.scale_outer = jax.random.normal(k_s2, (1, 10), jnp.float32)  # UnsupportedModule.scale

        # --- init-time folds (perf feedback): cached, not recomputed per call ---
        self.w_t = jnp.transpose(self.w)                                   # (F_in, F_out)
        combined = 2.0 * self.scale_inner * self.scale_outer               # unsupported(z,z)=2z folded
        self.params = jnp.concatenate(
            [self.b.reshape(1, 10), combined], axis=0
        ).astype(jnp.float32)                                              # (2, F_out)

    def __call__(self, x):
        return unsupported_module_forward(x, self.w_t, self.params)


if __name__ == "__main__":
    key = jax.random.PRNGKey(0)
    k_param, k_x = jax.random.split(key)

    x = jax.random.normal(k_x, (8, 10), jnp.float32)

    mod = UnsupportedModule(k_param)
    out = jax.block_until_ready(mod(x))

    # Pure-JAX reference of the same forward (original, unfolded formulation).
    z = jnp.maximum(x @ mod.w.T + mod.b, 0.0) * mod.scale_inner * mod.scale_outer
    ref = z + z
    assert out.shape == ref.shape
    assert jnp.allclose(out, ref, atol=1e-5, rtol=1e-5)

    print("KERNEL_OK")
</pallas_src>

<mosaic_0001>
module attributes {stable_mosaic.version = 11 : i64} {
  func.func @_unsupported_module_kernel(%arg0: memref<8x10xf32, #tpu.memory_space<vmem>>, %arg1: memref<10x10xf32, #tpu.memory_space<vmem>>, %arg2: memref<2x10xf32, #tpu.memory_space<vmem>>, %arg3: memref<8x10xf32, #tpu.memory_space<vmem>>) attributes {dimension_semantics = [], scalar_prefetch = 0 : i64, scratch_operands = 0 : i64, tpu.core_type = #tpu.core_type<tc>} {
    %c0 = arith.constant 0 : index
    %c0_0 = arith.constant 0 : index
    %0 = vector.load %arg0[%c0, %c0_0] : memref<8x10xf32, #tpu.memory_space<vmem>>, vector<8x10xf32>
    %c0_1 = arith.constant 0 : index
    %c0_2 = arith.constant 0 : index
    %1 = vector.load %arg1[%c0_1, %c0_2] : memref<10x10xf32, #tpu.memory_space<vmem>>, vector<10x10xf32>
    %cst = arith.constant dense<0.000000e+00> : vector<8x10xf32>
    %2 = tpu.matmul %0, %1, %cst {dimension_numbers = #tpu.dot_dimension_numbers<[1], [0], [0], [1], [0, 0, 1, 1], [], []>} : vector<8x10xf32>, vector<10x10xf32>, vector<8x10xf32> -> vector<8x10xf32>
    %c0_3 = arith.constant 0 : index
    %c0_4 = arith.constant 0 : index
    %3 = vector.load %arg2[%c0_3, %c0_4] : memref<2x10xf32, #tpu.memory_space<vmem>>, vector<1x10xf32>
    %4 = vector.broadcast %3 : vector<1x10xf32> to vector<8x10xf32>
    %5 = arith.addf %2, %4 : vector<8x10xf32>
    %cst_5 = arith.constant 0.000000e+00 : f32
    %6 = vector.broadcast %cst_5 : f32 to vector<8x10xf32>
    %7 = arith.maximumf %5, %6 : vector<8x10xf32>
    %c1 = arith.constant 1 : index
    %c0_6 = arith.constant 0 : index
    %8 = vector.load %arg2[%c1, %c0_6] : memref<2x10xf32, #tpu.memory_space<vmem>>, vector<1x10xf32>
    %9 = vector.broadcast %8 : vector<1x10xf32> to vector<8x10xf32>
    %10 = arith.mulf %7, %9 : vector<8x10xf32>
    %c0_7 = arith.constant 0 : index
    %c0_8 = arith.constant 0 : index
    %11 = vector.load %arg3[%c0_7, %c0_8] : memref<8x10xf32, #tpu.memory_space<vmem>>, vector<8x10xf32>
    tpu.vector_store %arg3[%c0_7, %c0_8], %10 {strides = array<i32>} : memref<8x10xf32, #tpu.memory_space<vmem>>, vector<8x10xf32>,
    return
  }
}

</mosaic_0001>

<bundles_post_ra>
// kernel: tpu_custom_call.1
= control target key start
LH: loop header
LB: loop body
LE: loop exit
PB: predicated region body
PF: predicated region fallthrough
CT: control target
= control target key end

     0   :  { %8 = vsyncpa [#allocation3], 0  ;;  %s280_s0 = inlined_call_operand.hbm [shape: f32[8,10], index: 0, kind: input, shape index: {}]   ;;  %s281_s1 = inlined_call_operand.hbm [shape: f32[10,10], index: 1, kind: input, shape index: {}]   ;;  %s282_s2 = inlined_call_operand.vmem [shape: f32[2,10], index: 2, kind: input, shape index: {}]   ;;  %s283_s3 = inlined_call_operand.hbm [shape: f32[8,10], index: 3, kind: output, shape index: {}]  }
   0x1   :  { %9 = vsyncpa [#allocation6], 0 }
   0x2   :  { %10 = vsyncpa [#allocation4], 0  ;;  %s238_s12 = smov [#allocation2]   ;;  %s239_s14 = smov [#allocation5]  }
   0x3   :  { %s17_s13 = sshll.u32 %s238_s12, 4  ;;  %s26_s15 = sshll.u32 %s239_s14, 4  ;;  %s18_s13 = int_to_ptr.vmem [resolvable:$true] %s17_s13  ;;  %s27_s15 = int_to_ptr.vmem [resolvable:$true] %s26_s15 }
   0x4   :  { %s180_s16 = scalar_lea.vmem %s18_s13, 128  ;;  %p185_p1 = scmp.lt.s32.totalorder %s18_s13, %s18_s13 }
   0x5   :  { %p181_p0 = scmp.ne.s32.totalorder %s18_s13, %s180_s16  ;;  %p186_p2 = scmp.lt.s32.totalorder %s180_s16, %s180_s16 }
   0x7   :  { %p187_p3 = por %p186_p2, %p185_p1 }
   0x9   :  { %p188_p4 = pnand %p187_p3, %p181_p0 }
   0xb   :  { %191 = shalt.err (!%p188_p4)
}
   0xc   :  { %20 = dma.hbm_to_vmem [thread:$0]  %s280_s0, 128, %s18_s13, [#allocation3]  }
   0xd   :  { %s200_s19 = scalar_lea.vmem %s27_s15, 256  ;;  %p205_p6 = scmp.lt.s32.totalorder %s27_s15, %s27_s15 }
   0xe   :  { %p201_p5 = scmp.ne.s32.totalorder %s27_s15, %s200_s19  ;;  %p206_p7 = scmp.lt.s32.totalorder %s200_s19, %s200_s19 }
  0x10   :  { %p207_p8 = por %p206_p7, %p205_p6 }
  0x12   :  { %p208_p9 = pnand %p207_p8, %p201_p5 }
  0x14   :  { %211 = shalt.err (!%p208_p9)
}
  0x15   :  { %s240_s20 = smov 128   ;;  %s241_s21 = smov 8  }
  0x16   :  { %32 = dma.hbm_to_vmem [thread:$0]  %s281_s1, 256, %s27_s15, [#allocation6], %s240_s20, %s240_s20, %s241_s21  }
  0x17   :  { %232 = dma.done.wait [#allocation3], 128  }
  0x18   :  { %233 = vsyncadd [#allocation3], 4294967168 }
  0x19   :  { %234 = dma.done.wait [#allocation6], 256  }
  0x1a   :  { %235 = vsyncadd [#allocation6], 4294967040  ;;  %v242_v0 = vmov 0.0   ;;  %vm243_vm0 = vmmov 0   ;;  %vm53_vm1 = vcmask 1041408   ;;  %v42_v2 = vld [vmem:[#allocation5] sm:$0xff] }
  0x1b   :  { %158 = vmatprep.subr.mxu0 %v242_v0  ;;  %162 = vmatprep.mubr.msk.f32.mxu0 %vm243_vm0, %v242_v0  ;;  %v43_v1 = vld [vmem:[#allocation5 + $0x8] sm:$0x3]  ;;  %v41_v3 = vld [vmem:[#allocation2] sm:$0xff]  ;;  %vm49_vm2 = vcmask 80896   ;;  %s244_s26 = smov [#allocation7]  }
  0x1c   :  { %159 = vmatpush3.msk.msra.mxu0 %vm53_vm1, %v43_v1  ;;  %v151_v4 = vld [vmem:[%s282_s2] ss:$0 sm:$0xff]  ;;  %v154_v7 = vld [vmem:[%s282_s2 + $0x1] ss:$0 sm:$0xff]  ;;  %s141_s27 = sshll.u32 %s244_s26, 4  ;;  %s142_s27 = int_to_ptr.vmem [resolvable:$true] %s141_s27 }
  0x1d   :  { %160 = vmatprep.subr.mxu0 %v242_v0  ;;  %s212_s28 = scalar_lea.vmem %s142_s27, 128  ;;  %p217_p11 = scmp.lt.s32.totalorder %s142_s27, %s142_s27 }
  0x1e   :  { %161 = vmatpush3.msra.mxu0 %v42_v2  ;;  %p213_p10 = scmp.ne.s32.totalorder %s142_s27, %s212_s28  ;;  %p218_p12 = scmp.lt.s32.totalorder %s212_s28, %s212_s28 }
  0x1f   :  { %163 = vmatmul.mubr.msk.f32.vlgmr.msra.gmra.mxu0 %vm49_vm2, %v41_v3 }
  0x20   :  { %p219_p13 = por %p218_p12, %p217_p11 }
  0x22   :  { %p220_p0 = pnand %p219_p13, %p213_p10 }
  0xdf   :  { %v123_v5 = vpop.f32.mrf.mxu0 }
  0xe0   :  { %v124_v6 = vadd.f32 %v151_v4, %v123_v5 }
  0xe1   :  { %v164_v8 = vpop.f32.mrf.mxu0 }
  0xe2   :  { %v127_v9 = vmax.f32 %v124_v6, 0.0 }
  0xe4   :  { %v133_v10 = vmul.f32 %v154_v7, %v127_v9 }
  0xe6   :  { %134 = vst.msk [vmem:[#allocation7] sm:$0xff] %vm49_vm2, %v133_v10 }
  0xe7   :  { %223 = shalt.err (!%p220_p0)
}
  0xe8   :  { %144 = dma.vmem_to_hbm [thread:$0]  %s142_s27, 128, %s283_s3, [#allocation4]  }
  0xe9   :  { %236 = dma.done.wait [#allocation4], 128  }
  0xea   :  { %237 = vsyncadd [#allocation4], 4294967168 }
  0xeb   :  { %148 = vsyncpa [#allocation3], 1 }
  0xec   :  { %149 = vsyncpa [#allocation6], 1 }
  0xed   :  { %150 = vsyncpa [#allocation4], 1 }

</bundles_post_ra>
